<compile_context>
chip_gen: v6e
topology: v6e:2x2x1
jax: 0.10.0
libtpu: 0.0.40
codegen_flags: <defaults>
</compile_context>

<pallas_src>
import functools

import jax
import jax.numpy as jnp
from jax.experimental import pallas as pl
from jax.experimental.pallas import tpu as pltpu


def _focal_loss_kernel(x_ref, t_ref, w_ref, o_ref, *, alpha, gamma, n_rows, tn):
    # x_ref: (TN, C) logits in native dtype; all arithmetic in f32.
    x = x_ref[...].astype(jnp.float32)
    t = t_ref[...]                        # (TN, 1) int32 target indices
    w_t = w_ref[...]                      # (TN, 1) f32 weight of the target class

    # numerically-stable log-sum-exp over the class (lane) dimension
    m = jnp.max(x, axis=-1, keepdims=True)                                 # (TN, 1)
    lse = m + jnp.log(jnp.sum(jnp.exp(x - m), axis=-1, keepdims=True))     # (TN, 1)

    # target-logit gather as one fused select+reduce (fewer (TN,C) temporaries)
    cols = jax.lax.broadcasted_iota(jnp.int32, x.shape, 1)                 # (TN, C)
    logit_t = jnp.sum(jnp.where(cols == t, x, 0.0), axis=-1, keepdims=True)

    ce = w_t * (lse - logit_t)            # weighted CE per row
    pt = jnp.exp(-ce)
    one_minus_pt = jnp.maximum(1.0 - pt, 0.0)   # clamp: f32 rounding can make pt > 1

    g = float(gamma)
    if g == int(g) and 0 <= int(g) <= 8:
        gi = int(g)
        # integer gamma -> g-1 VPU multiplies (no pow / exp-log chain)
        mod = jnp.ones_like(one_minus_pt) if gi == 0 else one_minus_pt
        for _ in range(gi - 1):
            mod = mod * one_minus_pt
    else:
        mod = jnp.power(one_minus_pt, jnp.float32(g))

    focal = jnp.float32(alpha) * mod * ce                                   # (TN, 1)

    # mask rows beyond the true batch size (last tile's OOB rows hold unspecified data)
    row = pl.program_id(0) * tn + jax.lax.broadcasted_iota(jnp.int32, focal.shape, 0)
    focal = jnp.where(row < n_rows, focal, 0.0)

    # one scalar per tile, broadcast over a lane/sublane-dense (1, 8, 128) output block
    o_ref[...] = jnp.broadcast_to(jnp.sum(focal), o_ref.shape)


def focal_loss(inputs, targets, class_weights=None, alpha=1.0, gamma=2.0):
    """Pallas TPU implementation of FocalLoss.forward.

    inputs:  (N, C) float logits (any float dtype; DMA'd in native dtype)
    targets: (N,)   integer class indices
    class_weights: optional (C,) per-class weights
    """
    n, c = inputs.shape
    itemsize = jnp.dtype(inputs.dtype).itemsize

    # --- batch tile sizing ---------------------------------------------------------------
    # VMEM model per row: 2x double-buffered inputs (logits + target + weight)
    #                     + ~4x one f32 row of in-kernel (TN,C) temporaries.
    # Budget ~40 MiB keeps the working set safe on v7x's 64 MiB VMEM while giving multi-MiB
    # logits tiles (amortizes the ~0.35us fixed per-grid-step overhead).
    per_row_bytes = 2 * (c * itemsize + 4 + 4) + 4 * c * 4
    budget = 40 * 1024 * 1024
    tn = max(8, min(8192, (budget // per_row_bytes) // 8 * 8))
    if n <= 8:
        tn = n                              # block dim == full array dim (always legal)
    else:
        tn = min(tn, (n // 8) * 8)          # keep the sublane dim a multiple of 8
    num_tiles = pl.cdiv(n, tn)              # last tile may be partial -> masked in-kernel

    # --- wrapper-side prep: O(N) only, no full-logits copy/pad ----------------------------
    t_i = targets.astype(jnp.int32)
    cw = (jnp.ones((c,), jnp.float32) if class_weights is None
          else class_weights.astype(jnp.float32))
    t = t_i.reshape(n, 1)
    w = cw[t_i].reshape(n, 1)               # per-row target-class weight

    kernel = functools.partial(
        _focal_loss_kernel,
        alpha=float(alpha), gamma=float(gamma), n_rows=n, tn=tn)

    cost = pl.CostEstimate(
        flops=int(8 * n * c),
        transcendentals=int(n * (c + 4)),   # exp per logit + exp/log/pow per row
        bytes_accessed=int(n * c * itemsize + 2 * n * 4 + num_tiles * 8 * 128 * 4),
    )

    per_tile = pl.pallas_call(
        kernel,
        out_shape=jax.ShapeDtypeStruct((num_tiles, 8, 128), jnp.float32),
        grid=(num_tiles,),
        in_specs=[
            pl.BlockSpec((tn, c), lambda i: (i, 0)),     # logits tile (full, unpadded class dim)
            pl.BlockSpec((tn, 1), lambda i: (i, 0)),     # target indices
            pl.BlockSpec((tn, 1), lambda i: (i, 0)),     # per-row target-class weight
        ],
        out_specs=pl.BlockSpec((1, 8, 128), lambda i: (i, 0, 0)),
        compiler_params=pltpu.CompilerParams(
            dimension_semantics=("parallel",),           # megacore-shardable on v7x
            vmem_limit_bytes=64 * 1024 * 1024,
        ),
        cost_estimate=cost,
    )(inputs, t, w)

    # each tile's block is a broadcast of its partial sum; pick one element per tile
    total = jnp.sum(per_tile[:, 0, 0])
    return total / jnp.float32(n)


if __name__ == "__main__":
    key = jax.random.PRNGKey(0)
    k_x, k_t = jax.random.split(key)

    # small synthetic shapes: batch=10 (deliberately not tile-aligned), num_classes=16
    N, C = 10, 16
    inputs = jax.random.normal(k_x, (N, C), dtype=jnp.float32)
    targets = jax.random.randint(k_t, (N,), 0, C, dtype=jnp.int32)
    class_weights = jnp.linspace(0.5, 1.5, C, dtype=jnp.float32)

    def ref_focal(x, t, cw, alpha, gamma):
        logp = jax.nn.log_softmax(x, axis=-1)
        w = jnp.ones((x.shape[1],), jnp.float32) if cw is None else cw
        ce = w[t] * (-logp[jnp.arange(x.shape[0]), t])
        pt = jnp.exp(-ce)
        return jnp.mean(alpha * (1.0 - pt) ** gamma * ce)

    # weighted, integer gamma
    loss = focal_loss(inputs, targets, class_weights, alpha=1.0, gamma=2.0)
    jax.block_until_ready(loss)
    ref = ref_focal(inputs, targets, class_weights, 1.0, 2.0)
    assert jnp.allclose(loss, ref, rtol=1e-5, atol=1e-5), (loss, ref)

    # unweighted, non-integer gamma (exercises the pow path and the clamp)
    loss2 = focal_loss(inputs, targets, None, alpha=0.25, gamma=1.5)
    jax.block_until_ready(loss2)
    ref2 = ref_focal(inputs, targets, None, 0.25, 1.5)
    assert jnp.allclose(loss2, ref2, rtol=1e-5, atol=1e-5), (loss2, ref2)

    print("KERNEL_OK")
</pallas_src>

<mosaic_0001>
module attributes {stable_mosaic.version = 11 : i64} {
  func.func @_focal_loss_kernel(%arg0: i32, %arg1: memref<8x16xf32, #tpu.memory_space<vmem>>, %arg2: memref<8x1xi32, #tpu.memory_space<vmem>>, %arg3: memref<8x1xf32, #tpu.memory_space<vmem>>, %arg4: memref<1x8x128xf32, #tpu.memory_space<vmem>>) attributes {dimension_semantics = [#tpu.dimension_semantics<parallel>], iteration_bounds = array<i64: 2>, scalar_prefetch = 0 : i64, scratch_operands = 0 : i64, tpu.core_type = #tpu.core_type<tc>, window_params = [{transform_indices = @transform_0, window_bounds = array<i64: 8, 16>}, {transform_indices = @transform_1, window_bounds = array<i64: 8, 1>}, {transform_indices = @transform_2, window_bounds = array<i64: 8, 1>}, {transform_indices = @transform_3, window_bounds = array<i64: 1, 8, 128>}]} {
    %c0 = arith.constant 0 : index
    %c0_0 = arith.constant 0 : index
    %0 = vector.load %arg1[%c0, %c0_0] : memref<8x16xf32, #tpu.memory_space<vmem>>, vector<8x16xf32>
    %c0_1 = arith.constant 0 : index
    %c0_2 = arith.constant 0 : index
    %1 = vector.load %arg2[%c0_1, %c0_2] : memref<8x1xi32, #tpu.memory_space<vmem>>, vector<8x1xi32>
    %c0_3 = arith.constant 0 : index
    %c0_4 = arith.constant 0 : index
    %2 = vector.load %arg3[%c0_3, %c0_4] : memref<8x1xf32, #tpu.memory_space<vmem>>, vector<8x1xf32>
    %cst = arith.constant dense<0xFF800000> : vector<8xf32>
    %3 = vector.multi_reduction <maximumf>, %0, %cst [1] : vector<8x16xf32> to vector<8xf32>
    %4 = vector.shape_cast %3 : vector<8xf32> to vector<8x1xf32>
    %5 = vector.broadcast %4 : vector<8x1xf32> to vector<8x16xf32>
    %6 = arith.subf %0, %5 : vector<8x16xf32>
    %7 = math.exp %6 : vector<8x16xf32>
    %cst_5 = arith.constant dense<0.000000e+00> : vector<8xf32>
    %8 = vector.multi_reduction <add>, %7, %cst_5 [1] : vector<8x16xf32> to vector<8xf32>
    %9 = vector.shape_cast %8 : vector<8xf32> to vector<8x1xf32>
    %10 = math.log %9 : vector<8x1xf32>
    %11 = arith.addf %4, %10 : vector<8x1xf32>
    %12 = tpu.iota {dimensions = array<i32: 1>} : vector<8x16xi32>
    %13 = vector.broadcast %1 : vector<8x1xi32> to vector<8x16xi32>
    %14 = arith.cmpi eq, %12, %13 : vector<8x16xi32>
    %cst_6 = arith.constant 0.000000e+00 : f32
    %15 = vector.broadcast %cst_6 : f32 to vector<8x16xf32>
    %16 = arith.select %14, %0, %15 : vector<8x16xi1>, vector<8x16xf32>
    %cst_7 = arith.constant dense<0.000000e+00> : vector<8xf32>
    %17 = vector.multi_reduction <add>, %16, %cst_7 [1] : vector<8x16xf32> to vector<8xf32>
    %18 = vector.shape_cast %17 : vector<8xf32> to vector<8x1xf32>
    %19 = arith.subf %11, %18 : vector<8x1xf32>
    %20 = arith.mulf %2, %19 : vector<8x1xf32>
    %cst_8 = arith.constant 0.000000e+00 : f32
    %21 = vector.broadcast %cst_8 : f32 to vector<8x1xf32>
    %22 = arith.subf %21, %20 : vector<8x1xf32>
    %23 = math.exp %22 : vector<8x1xf32>
    %cst_9 = arith.constant 1.000000e+00 : f32
    %24 = vector.broadcast %cst_9 : f32 to vector<8x1xf32>
    %25 = arith.subf %24, %23 : vector<8x1xf32>
    %cst_10 = arith.constant 0.000000e+00 : f32
    %26 = vector.broadcast %cst_10 : f32 to vector<8x1xf32>
    %27 = arith.maximumf %25, %26 : vector<8x1xf32>
    %28 = arith.mulf %27, %27 : vector<8x1xf32>
    %cst_11 = arith.constant 1.000000e+00 : f32
    %29 = vector.broadcast %cst_11 : f32 to vector<8x1xf32>
    %30 = arith.mulf %29, %28 : vector<8x1xf32>
    %31 = arith.mulf %30, %20 : vector<8x1xf32>
    %c8_i32 = arith.constant 8 : i32
    %32 = arith.muli %arg0, %c8_i32 : i32
    %33 = tpu.iota {dimensions = array<i32: 0>} : vector<8x1xi32>
    %34 = vector.broadcast %32 : i32 to vector<8x1xi32>
    %35 = arith.addi %34, %33 : vector<8x1xi32>
    %c10_i32 = arith.constant 10 : i32
    %36 = vector.broadcast %c10_i32 : i32 to vector<8x1xi32>
    %37 = arith.cmpi slt, %35, %36 : vector<8x1xi32>
    %cst_12 = arith.constant 0.000000e+00 : f32
    %38 = vector.broadcast %cst_12 : f32 to vector<8x1xf32>
    %39 = arith.select %37, %31, %38 : vector<8x1xi1>, vector<8x1xf32>
    %40 = vector.shape_cast %39 : vector<8x1xf32> to vector<1x8x1xf32>
    %cst_13 = arith.constant dense<0.000000e+00> : vector<1xf32>
    %41 = vector.multi_reduction <add>, %40, %cst_13 [1, 2] : vector<1x8x1xf32> to vector<1xf32>
    %42 = vector.shape_cast %41 : vector<1xf32> to vector<1x1x1xf32>
    %43 = vector.extract %42[0, 0, 0] : f32 from vector<1x1x1xf32>
    %44 = vector.broadcast %43 : f32 to vector<1x8x128xf32>
    %c0_14 = arith.constant 0 : index
    %c0_15 = arith.constant 0 : index
    %c0_16 = arith.constant 0 : index
    %45 = vector.load %arg4[%c0_14, %c0_15, %c0_16] : memref<1x8x128xf32, #tpu.memory_space<vmem>>, vector<1x8x128xf32>
    tpu.vector_store %arg4[%c0_14, %c0_15, %c0_16], %44 {strides = array<i32>} : memref<1x8x128xf32, #tpu.memory_space<vmem>>, vector<1x8x128xf32>,
    return
  }
  func.func @transform_0(%arg0: i32) -> (i32, i32) {
    %c0_i32 = arith.constant 0 : i32
    %c0_i32_0 = arith.constant 0 : i32
    return %arg0, %c0_i32 : i32, i32
  }
  func.func @transform_1(%arg0: i32) -> (i32, i32) {
    %c0_i32 = arith.constant 0 : i32
    %c0_i32_0 = arith.constant 0 : i32
    return %arg0, %c0_i32 : i32, i32
  }
  func.func @transform_2(%arg0: i32) -> (i32, i32) {
    %c0_i32 = arith.constant 0 : i32
    %c0_i32_0 = arith.constant 0 : i32
    return %arg0, %c0_i32 : i32, i32
  }
  func.func @transform_3(%arg0: i32) -> (i32, i32, i32) {
    %c0_i32 = arith.constant 0 : i32
    %c0_i32_0 = arith.constant 0 : i32
    %c0_i32_1 = arith.constant 0 : i32
    return %arg0, %c0_i32, %c0_i32_0 : i32, i32, i32
  }
}

</mosaic_0001>

<bundles_post_ra>
// kernel: tpu_custom_call.1
= control target key start
LH: loop header
LB: loop body
LE: loop exit
PB: predicated region body
PF: predicated region fallthrough
CT: control target
= control target key end

     0   :  { %8 = vsyncpa [#allocation3], 0  ;;  %s606_s0 = inlined_call_operand.vmem [shape: f32[10,16], index: 0, kind: input, shape index: {}]   ;;  %s607_s1 = inlined_call_operand.vmem [shape: s32[10,1], index: 1, kind: input, shape index: {}]   ;;  %s608_s2 = inlined_call_operand.vmem [shape: f32[10,1], index: 2, kind: input, shape index: {}]   ;;  %s609_s3 = inlined_call_operand.hbm [shape: f32[2,8,128], index: 3, kind: output, shape index: {}]  }
   0x1   :  { %10 = vsyncpa [#allocation3 + $0x1], 0  ;;  %s498_s12 = smov 0   ;;  %s500_s13 = smov 0  }
   0x2   :  { %s502_s14 = smov 0   ;;  %s504_s15 = smov 0  }
   0x3 LB: > { %s519_s16 = sadd.s32 4294967295, %s474_s15   ;;  %s352_s17 = sadd.s32 4294967294, %s474_s15   ;;  %s474_s15 = sphi %s504_s15, %s615_s15   ;;  %s470_s14 = sphi %s502_s14, %s614_s14   ;;  %s466_s13 = sphi %s500_s13, %s613_s13   ;;  %s462_s12 = sphi %s498_s12, %s612_s12  }
   0x4   : > { %s523_s18 = sadd.s32 1, %s474_s15   ;;  %s101_s19 = sadd.s32 1, %s470_s14 }
   0x5   : > { %s98_s20 = ssub.s32 %s474_s15, %s523_s18  ;;  %p111_p0 = scmp.ne.s32.totalorder %s470_s14, %s466_s13 }
   0x6   : > { %p99_p1 = scmp.eq.s32.totalorder %s98_s20, 0  ;;  %p112_p2 = scmp.eq.s32.totalorder %s519_s16, 1 }
   0x7   : > { %p117_p3 = scmp.ne.s32.totalorder %s466_s13, %s462_s12  ;;  %p118_p4 = scmp.eq.s32.totalorder %s352_s17, 1 }
   0x8   : > { %s534_s21 = scalar_select %p99_p1, %s470_s14, %s101_s19  }
   0x9   : > { %p536_p5 = por %p112_p2, %p111_p0  ;;  %p540_p6 = por %p118_p4, %p117_p3 }
   0xa   : > { %p355_p7 = scmp.ge.s32.totalorder %s474_s15, 1  ;;  %p157_p8 = scmp.lt.s32.totalorder %s474_s15, 3 }
   0xc   : > { %p158_p9 = pnand %p355_p7, %p157_p8 }
   0xd   : > { %p188_p10 = scmp.lt.s32.totalorder (!%p158_p9), %s519_s16, 1  ;;  %s360_s8 = sshll.u32 (!%p158_p9), %s519_s16, 3 }
   0xe   : > { %161 = sbr.rel (%p158_p9) target bundleno = 584 (0x248), region = 32  ;;  %s185_s9 = sand.u32 (!%p158_p9), 1, %s466_s13  }
   0xf   : > { %s356_s10 = sshll.u32 (!%p158_p9), %s185_s9, 3  ;;  %s362_s19 = sshll.u32 (!%p158_p9), %s519_s16, 7 }
  0x10   : > { %s187_s11 = scalar_lea.vmem (!%p158_p9), [#allocation2], %s356_s10  ;;  %s267_s26 = scalar_lea.hbm (!%p158_p9), %s609_s3, %s362_s19 }
  0x11   : > { %s269_s17 = sshll.u32 (!%p158_p9), %s187_s11, 4  ;;  %s256_s27 = scalar_lea.sflag (!%p158_p9), [#allocation3], %s185_s9  ;;  %s568_s17 = int_to_ptr.vmem [resolvable:$true] %s269_s17 }
  0x12   : > { %s477_s29 = smov (!%p158_p9), [#allocation2]  }
  0x13   : > { %v476_v0 = vmov 0   ;;  %s189_s24 = scalar_select %p188_p10, %s519_s16, 1  ;;  %vm203_vm0 = vcmask 130048   ;;  %v216_v7 = vlaneseq  ;;  %v238_v25 = vstv %s360_s8 }
  0x14   : > { %407 = vset.pattern.permute.xlu0 %v476_v0  ;;  %vm242_vm3 = vcmask 7168   ;;  %s418_s16 = sshll.u32 %s477_s29, 4  ;;  %s419_s16 = int_to_ptr.vmem [resolvable:$false] %s418_s16 }
  0x15   : > { %s548_s25 = sshll.u32 %s189_s24, 3  ;;  %v217_v8 = vand.u32 127, %v216_v7  ;;  %v237_v24 = vshrl.u32 %v216_v7, 7  ;;  %s420_s30 = scalar_lea.vmem %s419_s16, 256 }
  0x16   : > { %s191_s28 = scalar_lea.vmem %s606_s0, %s548_s25  ;;  %s195_s4 = scalar_lea.vmem %s607_s1, %s548_s25 }
  0x17   : > { %v200_v1 = vld [vmem:[%s191_s28] sm:$0xff]  ;;  %s199_s7 = scalar_lea.vmem %s608_s2, %s548_s25  ;;  %v239_v28 = vadd.s32 %v238_v25, %v237_v24  ;;  %s414_s28 = scalar_lea.vmem %s568_s17, 128 }
  0x18   : > { %v204_v2 = vsel %vm203_vm0, %v200_v1, -inf  ;;  %v201_v3 = vld [vmem:[%s195_s4] sm:$0xff]  ;;  %p415_p11 = scmp.ne.s32.totalorder %s568_s17, %s414_s28  ;;  %p421_p0 = scmp.lt.s32.totalorder %s568_s17, %s419_s16 }
  0x19   : > { %205 = vmax.xlane.f32.xlu0 %v204_v2  ;;  %v202_v19 = vld [vmem:[%s199_s7] sm:$0xff]  ;;  %vm240_vm2 = vcmp.lt.s32.totalorder %v239_v28, 10  ;;  %p422_p1 = scmp.lt.s32.totalorder %s420_s30, %s414_s28 }
  0x1a   : > { %p416_p12 = pnand %p415_p11, %p536_p5 }
  0x1b   : > { %p423_p2 = por %p422_p1, %p421_p0 }
  0x1c   : > { %p417_p13 = pneg %p416_p12 }
  0x1e   : > { %p424_p3 = pnand %p423_p2, %p417_p13 }
  0x2f   : > { %219 = vperm.xlu0 %407, %v201_v3  }
  0xa2   : > { %v206_v4 = vpop.xlane.xlu0 %205 }
  0xa3   : > { %v207_v5 = vsub.f32 %v200_v1, %v206_v4 }
  0xa5   : > { %v208_v6 = vmul.f32 1.442695, %v207_v5 }
  0xa7   : > { %408 = vpow2.f32 %v208_v6 }
  0xaa   : > { %v220_v9 = vpop.permute.xlu0 %219 }
  0xab   : > { %vm221_vm1 = vcmp.eq.s32.totalorder %v217_v8, %v220_v9 }
  0xac   : > { %v222_v11 = vsel %vm221_vm1, %v200_v1, 0.0 }
  0xad   : > { %v223_v13 = vsel %vm203_vm0, %v222_v11, 0.0 }
  0xb4   : > { %v409_v10 = vpop.eup %408 }
  0xb5   : > { %v210_v12 = vsel %vm203_vm0, %v409_v10, 0.0 }
  0xb6   : > { %211 = vadd.xlane.f32.xlu1 %v210_v12 }
  0xba   : > { %224 = vadd.xlane.f32.xlu1 %v223_v13 }
 0x13f   : > { %v212_v14 = vpop.xlane.xlu1 %211 }
 0x140   : > { %410 = vlog2.f32 %v212_v14 }
 0x143   : > { %v225_v17 = vpop.xlane.xlu1 %224 }
 0x14d   : > { %v411_v15 = vpop.eup %410 }
 0x14e   : > { %v214_v16 = vmul.f32 0.6931472, %v411_v15 }
 0x150   : > { %v215_v18 = vadd.f32 %v214_v16, %v206_v4 }
 0x152   : > { %v226_v20 = vsub.f32 %v215_v18, %v225_v17 }
 0x154   : > { %v227_v21 = vmul.f32 %v226_v20, %v202_v19 }
 0x156   : > { %v228_v22 = vsub.f32 0.0, %v227_v21 }
 0x158   : > { %v229_v23 = vmul.f32 1.442695, %v228_v22 }
 0x15a   : > { %412 = vpow2.f32 %v229_v23 }
 0x167   : > { %v413_v26 = vpop.eup %412 }
 0x168   : > { %v231_v27 = vsub.f32 1.0, %v413_v26 }
 0x16a   : > { %v232_v29 = vmax.f32 %v231_v27, 0.0 }
 0x16c   : > { %v233_v30 = vmul.f32 %v232_v29, %v232_v29 }
 0x16e   : > { %v234_v31 = vmul.f32 %v233_v30, %v227_v21 }
 0x170   : > { %v241_v32 = vsel %vm240_vm2, %v234_v31, 0.0 }
 0x171   : > { %v243_v33 = vsel %vm242_vm3, %v241_v32, 0.0 }
 0x172   : > { %244 = vadd.xlane.f32.xlu1 %v243_v33 }
 0x1fb   : > { %v245_v34 = vpop.xlane.xlu1 %244 }
 0x1fc   : > { %v246_v35 = vrot.slane %v245_v34, 4 }
 0x1fe   : > { %v247_v36 = vadd.f32 %v246_v35, %v245_v34 }
 0x200   : > { %v248_v37 = vrot.slane %v247_v36, 2 }
 0x202   : > { %v249_v38 = vadd.f32 %v248_v37, %v247_v36 }
 0x204   : > { %v250_v39 = vrot.slane %v249_v38, 1 }
 0x206   : > { %v251_v40 = vadd.f32 %v250_v39, %v249_v38 }
 0x208   : > { %365 = vpush %v251_v40 }
 0x239   : > { %s366_s20 = spop %365 }
 0x23a   : > { %v253_v41 = vstv %s366_s20 }
 0x23b   : > { %254 = vst [vmem:[%s187_s11] sm:$0xff] %v253_v41 }
 0x23c   : > { %427 = shalt.err (!%p424_p3)
}
 0x23d   : > { %s428_s4 = scalar_lea.hbm %s267_s26, 128  ;;  %s432_s7 = scalar_lea.hbm %s609_s3, 256 }
 0x23e   : > { %p429_p4 = scmp.ne.s32.totalorder %s267_s26, %s428_s4  ;;  %p433_p9 = scmp.lt.s32.totalorder %s267_s26, %s609_s3 }
 0x23f   : > { %p434_p10 = scmp.lt.s32.totalorder %s432_s7, %s428_s4 }
 0x240   : > { %p430_p7 = pnand %p429_p4, %p536_p5 }
 0x241   : > { %p435_p11 = por %p434_p10, %p433_p9 }
 0x242   : > { %p431_p8 = pneg %p430_p7 }
 0x244   : > { %p436_p12 = pnand %p435_p11, %p431_p8 }
 0x246   : > { %439 = shalt.err (!%p436_p12)
}
 0x247   : > { %367 = dma.vmem_to_hbm [thread:$0]  (%p536_p5), %s568_s17, 128, %s267_s26, %s256_s27  }
 0x248 PF: > { %p373_p13 = scmp.ge.s32.totalorder %s474_s15, 2  ;;  %s281_s10 = sand.u32 1, %s462_s12  }
 0x249   : > { %s282_s11 = scalar_lea.sflag [#allocation3], %s281_s10 }
 0x24a   : > { %p370_p0 = pnand %p373_p13, %p540_p6 }
 0x24c   : > { %p371_p1 = pneg %p370_p0 }
 0x24e   : > { %457 = dma.done.wait (%p371_p1), %s282_s11, 128  }
 0x24f   : > { %459 = vsyncadd (%p371_p1), %s282_s11, 4294967168  ;;  %p13_p2 = scmp.ge.s32.totalorder %s523_s18, 4   ;;  %s612_s12 = smov %s466_s13 }
 0x250   : > { %s613_s13 = smov %s470_s14  ;;  %s614_s14 = smov %s534_s21 }
 0x251   : > { %s615_s15 = smov %s523_s18  ;;  %15 = sbr.rel (!%p13_p2) target bundleno = 3 (0x3), region = 73 }
 0x256   :  { %287 = vsyncpa [#allocation3], 1 }
 0x257   :  { %289 = vsyncpa [#allocation3 + $0x1], 1 }

</bundles_post_ra>
